<compile_context>
chip_gen: v5e
topology: v5e:2x2
jax: 0.10.0
libtpu: 0.0.40
codegen_flags: <defaults>
</compile_context>

<pallas_src>
import functools

import jax
import jax.numpy as jnp
from jax.experimental import pallas as pl
from jax.experimental.pallas import tpu as pltpu


def bahdanau_kernel(k_ref, xs_ref, mask_ref, wa_ref, wb_ref, e_ref, o_ref):
    BB, T, D = xs_ref.shape

    xs3 = xs_ref[...]                                   # (BB, T, D)
    xs2 = xs3.reshape(BB * T, D)                        # layout-preserving (T multiple of 8)

    # Wa(k): computed once per batch row (the torch .repeat is just a broadcast over T).
    a = jnp.dot(k_ref[...], wa_ref[...],
                preferred_element_type=jnp.float32)     # (BB, D)
    # Wb(xs): one big MXU matmul with M = BB*T.
    b = jnp.dot(xs2, wb_ref[...],
                preferred_element_type=jnp.float32)     # (BB*T, D)
    h = jnp.tanh(a[:, None, :] + b.reshape(BB, T, D))   # (BB, T, D)

    # scores = h . energy over D  -> lane-dense (BB, T)
    w = jnp.sum(h * e_ref[...], axis=-1)                # (BB, T)

    # masked_fill(~mask, -inf) with a large finite negative (NaN-safe).
    w = jnp.where(mask_ref[...] > 0.0, w, jnp.float32(-1e30))

    # softmax over T (last / lane axis)
    m = jnp.max(w, axis=-1, keepdims=True)              # (BB, 1)
    p = jnp.exp(w - m)                                  # (BB, T)
    s = jnp.sum(p, axis=-1, keepdims=True)              # (BB, 1)
    r = pl.reciprocal(s, approx=True)                   # EUP
    r = r * (2.0 - s * r)                               # one Newton step -> ~f32-exact
    attn = p * r                                        # (BB, T)

    # einsum('bi,bik->bk') on the MXU: (BB,1,T) x (BB,T,D) -> (BB,1,D)
    out = jnp.einsum('bqt,btd->bqd', attn[:, None, :], xs3,
                     preferred_element_type=jnp.float32)
    o_ref[...] = out[:, 0, :]                           # (BB, D)


def _pick_block_b(B, T, out_dim, target_bytes=1 << 20):
    """Batch block: multiple of 8, sized so the xs tile is ~1 MiB (capped by B, VMEM-safe)."""
    per_row = max(1, T * out_dim * 4)
    bb = max(8, (target_bytes // per_row) // 8 * 8)
    bb = min(bb, ((B + 7) // 8) * 8)
    return int(bb)


def bahdanau_attention(k, xs, wa_t, wb_t, energy, mask=None, block_b=None):
    """k: (B, in_dim), xs: (B, T, out_dim), wa_t: (in_dim, out_dim) == Wa.weight.T,
    wb_t: (out_dim, out_dim) == Wb.weight.T, energy: (out_dim,), mask: optional (B, T)."""
    B, in_dim = k.shape
    _, T, out_dim = xs.shape

    if mask is None:
        mask2 = jnp.ones((B, T), dtype=jnp.float32)
    else:
        mask2 = jnp.asarray(mask).reshape(B, T).astype(jnp.float32)

    if block_b is None:
        block_b = _pick_block_b(B, T, out_dim)
    block_b = max(8, (block_b // 8) * 8)

    # Pad B up to a multiple of block_b (padded rows use mask=1 -> harmless, sliced off below).
    pad = (-B) % block_b
    if pad:
        k = jnp.concatenate([k, jnp.zeros((pad, in_dim), k.dtype)], axis=0)
        xs_p = jnp.concatenate([xs, jnp.zeros((pad, T, out_dim), xs.dtype)], axis=0)
        mask2 = jnp.concatenate([mask2, jnp.ones((pad, T), jnp.float32)], axis=0)
    else:
        xs_p = xs
    Bp = B + pad
    grid_b = Bp // block_b

    e3 = jnp.asarray(energy).reshape(1, 1, out_dim).astype(jnp.float32)

    # Advisory cost estimate for XLA scheduling.
    flops = (2 * Bp * in_dim * out_dim            # Wa(k)
             + 2 * Bp * T * out_dim * out_dim     # Wb(xs)
             + 2 * Bp * T * out_dim               # energy contraction
             + 2 * Bp * T * out_dim)              # weighted sum
    transcendentals = Bp * T * out_dim + Bp * T   # tanh + exp
    bytes_accessed = 4 * (Bp * in_dim + Bp * T * out_dim + Bp * T
                          + in_dim * out_dim + out_dim * out_dim + out_dim
                          + Bp * out_dim)

    # Raise the scoped VMEM limit only if the per-step footprint needs it (cap 64 MiB for v7x).
    xs_block_bytes = block_b * T * out_dim * 4
    vmem_est = 6 * xs_block_bytes + 4 * (in_dim + out_dim + 1) * out_dim + (4 << 20)
    compiler_kwargs = dict(dimension_semantics=("parallel",))
    if vmem_est > (32 << 20):
        compiler_kwargs["vmem_limit_bytes"] = min(vmem_est, 64 << 20)

    out = pl.pallas_call(
        bahdanau_kernel,
        out_shape=jax.ShapeDtypeStruct((Bp, out_dim), jnp.float32),
        grid_spec=pltpu.PrefetchScalarGridSpec(
            num_scalar_prefetch=0,
            grid=(grid_b,),
            in_specs=[
                pl.BlockSpec((block_b, in_dim), lambda b: (b, 0)),         # k
                pl.BlockSpec((block_b, T, out_dim), lambda b: (b, 0, 0)),  # xs
                pl.BlockSpec((block_b, T), lambda b: (b, 0)),              # mask (lane-dense)
                pl.BlockSpec((in_dim, out_dim), lambda b: (0, 0)),         # Wa^T
                pl.BlockSpec((out_dim, out_dim), lambda b: (0, 0)),        # Wb^T
                pl.BlockSpec((1, 1, out_dim), lambda b: (0, 0, 0)),        # energy
            ],
            out_specs=pl.BlockSpec((block_b, out_dim), lambda b: (b, 0)),
        ),
        compiler_params=pltpu.CompilerParams(**compiler_kwargs),
        cost_estimate=pl.CostEstimate(flops=int(flops),
                                      transcendentals=int(transcendentals),
                                      bytes_accessed=int(bytes_accessed)),
    )(k, xs_p, mask2, wa_t, wb_t, e3)

    return out[:B]


def bahdanau_reference(k, xs, wa_t, wb_t, energy, mask=None):
    """Pure-JAX reference mirroring the PyTorch forward exactly."""
    B, T, _ = xs.shape
    ks = jnp.broadcast_to(k[:, None, :], (B, T, k.shape[-1]))
    w = jnp.tanh(ks @ wa_t + xs @ wb_t) @ energy                      # (B, T)
    if mask is not None:
        w = jnp.where(jnp.asarray(mask).reshape(B, T).astype(bool), w, -jnp.inf)
    attn = jax.nn.softmax(w, axis=-1)
    return jnp.einsum('bi,bik->bk', attn, xs)


if __name__ == "__main__":
    B, T, in_dim, out_dim = 16, 8, 32, 32

    key = jax.random.PRNGKey(0)
    k_k, k_xs, k_wa, k_wb, k_e, k_m = jax.random.split(key, 6)

    # Parameters (torch layout: Wa (out,in), Wb (out,out), energy (out,)); pass transposed.
    wa = jax.random.normal(k_wa, (out_dim, in_dim), dtype=jnp.float32) * 0.1
    wb = jax.random.normal(k_wb, (out_dim, out_dim), dtype=jnp.float32) * 0.1
    energy = jax.random.normal(k_e, (out_dim,), dtype=jnp.float32)
    wa_t = wa.T
    wb_t = wb.T

    # Inputs
    k_in = jax.random.normal(k_k, (B, in_dim), dtype=jnp.float32)
    xs = jax.random.normal(k_xs, (B, T, out_dim), dtype=jnp.float32)

    # Unmasked path (block_b=8 -> grid of length 2, exercises batched tiling).
    out = jax.block_until_ready(
        bahdanau_attention(k_in, xs, wa_t, wb_t, energy, block_b=8))
    ref = bahdanau_reference(k_in, xs, wa_t, wb_t, energy)
    assert out.shape == (B, out_dim)
    assert jnp.allclose(out, ref, atol=2e-4, rtol=2e-4), "mismatch vs reference (no mask)"

    # Masked path (every row keeps at least one position, matching -inf semantics).
    mask = jax.random.bernoulli(k_m, 0.7, (B, T)).at[:, 0].set(True)
    out_m = jax.block_until_ready(
        bahdanau_attention(k_in, xs, wa_t, wb_t, energy, mask=mask, block_b=8))
    ref_m = bahdanau_reference(k_in, xs, wa_t, wb_t, energy, mask=mask)
    assert jnp.allclose(out_m, ref_m, atol=2e-4, rtol=2e-4), "mismatch vs reference (masked)"

    print("KERNEL_OK")
</pallas_src>

<mosaic_0001>
module attributes {stable_mosaic.version = 11 : i64} {
  func.func @bahdanau_kernel(%arg0: i32, %arg1: memref<8x32xf32, #tpu.memory_space<vmem>>, %arg2: memref<8x8x32xf32, #tpu.memory_space<vmem>>, %arg3: memref<8x8xf32, #tpu.memory_space<vmem>>, %arg4: memref<32x32xf32, #tpu.memory_space<vmem>>, %arg5: memref<32x32xf32, #tpu.memory_space<vmem>>, %arg6: memref<1x1x32xf32, #tpu.memory_space<vmem>>, %arg7: memref<8x32xf32, #tpu.memory_space<vmem>>) attributes {dimension_semantics = [#tpu.dimension_semantics<parallel>], iteration_bounds = array<i64: 2>, scalar_prefetch = 0 : i64, scratch_operands = 0 : i64, tpu.core_type = #tpu.core_type<tc>, window_params = [{transform_indices = @transform_0, window_bounds = array<i64: 8, 32>}, {transform_indices = @transform_1, window_bounds = array<i64: 8, 8, 32>}, {transform_indices = @transform_2, window_bounds = array<i64: 8, 8>}, {pipeline_mode = #tpu.pipeline_mode<synchronous>, transform_indices = @transform_3, window_bounds = array<i64: 32, 32>}, {pipeline_mode = #tpu.pipeline_mode<synchronous>, transform_indices = @transform_4, window_bounds = array<i64: 32, 32>}, {pipeline_mode = #tpu.pipeline_mode<synchronous>, transform_indices = @transform_5, window_bounds = array<i64: 1, 1, 32>}, {transform_indices = @transform_6, window_bounds = array<i64: 8, 32>}]} {
    %c0 = arith.constant 0 : index
    %c0_0 = arith.constant 0 : index
    %c0_1 = arith.constant 0 : index
    %0 = vector.load %arg2[%c0, %c0_0, %c0_1] : memref<8x8x32xf32, #tpu.memory_space<vmem>>, vector<8x8x32xf32>
    %1 = vector.shape_cast %0 : vector<8x8x32xf32> to vector<64x32xf32>
    %c0_2 = arith.constant 0 : index
    %c0_3 = arith.constant 0 : index
    %2 = vector.load %arg1[%c0_2, %c0_3] : memref<8x32xf32, #tpu.memory_space<vmem>>, vector<8x32xf32>
    %c0_4 = arith.constant 0 : index
    %c0_5 = arith.constant 0 : index
    %3 = vector.load %arg4[%c0_4, %c0_5] : memref<32x32xf32, #tpu.memory_space<vmem>>, vector<32x32xf32>
    %cst = arith.constant dense<0.000000e+00> : vector<8x32xf32>
    %4 = tpu.matmul %2, %3, %cst {dimension_numbers = #tpu.dot_dimension_numbers<[1], [0], [0], [1], [0, 0, 1, 1], [], []>} : vector<8x32xf32>, vector<32x32xf32>, vector<8x32xf32> -> vector<8x32xf32>
    %c0_6 = arith.constant 0 : index
    %c0_7 = arith.constant 0 : index
    %5 = vector.load %arg5[%c0_6, %c0_7] : memref<32x32xf32, #tpu.memory_space<vmem>>, vector<32x32xf32>
    %cst_8 = arith.constant dense<0.000000e+00> : vector<64x32xf32>
    %6 = tpu.matmul %1, %5, %cst_8 {dimension_numbers = #tpu.dot_dimension_numbers<[1], [0], [0], [1], [0, 0, 1, 1], [], []>} : vector<64x32xf32>, vector<32x32xf32>, vector<64x32xf32> -> vector<64x32xf32>
    %7 = vector.shape_cast %4 : vector<8x32xf32> to vector<8x1x32xf32>
    %8 = vector.shape_cast %6 : vector<64x32xf32> to vector<8x8x32xf32>
    %9 = vector.broadcast %7 : vector<8x1x32xf32> to vector<8x8x32xf32>
    %10 = arith.addf %9, %8 : vector<8x8x32xf32>
    %11 = math.tanh %10 : vector<8x8x32xf32>
    %c0_9 = arith.constant 0 : index
    %c0_10 = arith.constant 0 : index
    %c0_11 = arith.constant 0 : index
    %12 = vector.load %arg6[%c0_9, %c0_10, %c0_11] : memref<1x1x32xf32, #tpu.memory_space<vmem>>, vector<1x1x32xf32>
    %13 = vector.broadcast %12 : vector<1x1x32xf32> to vector<8x8x32xf32>
    %14 = arith.mulf %11, %13 : vector<8x8x32xf32>
    %cst_12 = arith.constant dense<0.000000e+00> : vector<8x8xf32>
    %15 = vector.multi_reduction <add>, %14, %cst_12 [2] : vector<8x8x32xf32> to vector<8x8xf32>
    %c0_13 = arith.constant 0 : index
    %c0_14 = arith.constant 0 : index
    %16 = vector.load %arg3[%c0_13, %c0_14] : memref<8x8xf32, #tpu.memory_space<vmem>>, vector<8x8xf32>
    %cst_15 = arith.constant 0.000000e+00 : f32
    %17 = vector.broadcast %cst_15 : f32 to vector<8x8xf32>
    %18 = arith.cmpf ogt, %16, %17 : vector<8x8xf32>
    %cst_16 = arith.constant -1.000000e+30 : f32
    %19 = vector.broadcast %cst_16 : f32 to vector<8x8xf32>
    %20 = arith.select %18, %15, %19 : vector<8x8xi1>, vector<8x8xf32>
    %cst_17 = arith.constant dense<0xFF800000> : vector<8xf32>
    %21 = vector.multi_reduction <maximumf>, %20, %cst_17 [1] : vector<8x8xf32> to vector<8xf32>
    %22 = vector.shape_cast %21 : vector<8xf32> to vector<8x1xf32>
    %23 = vector.broadcast %22 : vector<8x1xf32> to vector<8x8xf32>
    %24 = arith.subf %20, %23 : vector<8x8xf32>
    %25 = math.exp %24 : vector<8x8xf32>
    %cst_18 = arith.constant dense<0.000000e+00> : vector<8xf32>
    %26 = vector.multi_reduction <add>, %25, %cst_18 [1] : vector<8x8xf32> to vector<8xf32>
    %27 = vector.shape_cast %26 : vector<8xf32> to vector<8x1xf32>
    %28 = tpu.reciprocal %27 {approx = true} : vector<8x1xf32> -> vector<8x1xf32>
    %29 = arith.mulf %27, %28 : vector<8x1xf32>
    %cst_19 = arith.constant 2.000000e+00 : f32
    %30 = vector.broadcast %cst_19 : f32 to vector<8x1xf32>
    %31 = arith.subf %30, %29 : vector<8x1xf32>
    %32 = arith.mulf %28, %31 : vector<8x1xf32>
    %33 = vector.broadcast %32 : vector<8x1xf32> to vector<8x8xf32>
    %34 = arith.mulf %25, %33 : vector<8x8xf32>
    %35 = vector.shape_cast %34 : vector<8x8xf32> to vector<8x1x8xf32>
    "tpu.trace_start"() <{level = 10 : i32, message = "bqt,btd->bqd"}> : () -> ()
    %cst_20 = arith.constant dense<0.000000e+00> : vector<8x1x32xf32>
    %36 = tpu.matmul %35, %0, %cst_20 {dimension_numbers = #tpu.dot_dimension_numbers<[2], [1], [1], [2], [0, 0, 0, 1, 1, 2], [0], [0]>} : vector<8x1x8xf32>, vector<8x8x32xf32>, vector<8x1x32xf32> -> vector<8x1x32xf32>
    "tpu.trace_stop"() : () -> ()
    %37 = vector.shape_cast %36 : vector<8x1x32xf32> to vector<8x32xf32>
    %c0_21 = arith.constant 0 : index
    %c0_22 = arith.constant 0 : index
    %38 = vector.load %arg7[%c0_21, %c0_22] : memref<8x32xf32, #tpu.memory_space<vmem>>, vector<8x32xf32>
    tpu.vector_store %arg7[%c0_21, %c0_22], %37 {strides = array<i32>} : memref<8x32xf32, #tpu.memory_space<vmem>>, vector<8x32xf32>,
    return
  }
  func.func @transform_0(%arg0: i32) -> (i32, i32) {
    %c0_i32 = arith.constant 0 : i32
    %c0_i32_0 = arith.constant 0 : i32
    return %arg0, %c0_i32 : i32, i32
  }
  func.func @transform_1(%arg0: i32) -> (i32, i32, i32) {
    %c0_i32 = arith.constant 0 : i32
    %c0_i32_0 = arith.constant 0 : i32
    %c0_i32_1 = arith.constant 0 : i32
    return %arg0, %c0_i32, %c0_i32_0 : i32, i32, i32
  }
  func.func @transform_2(%arg0: i32) -> (i32, i32) {
    %c0_i32 = arith.constant 0 : i32
    %c0_i32_0 = arith.constant 0 : i32
    return %arg0, %c0_i32 : i32, i32
  }
  func.func @transform_3(%arg0: i32) -> (i32, i32) {
    %c0_i32 = arith.constant 0 : i32
    %c0_i32_0 = arith.constant 0 : i32
    %c0_i32_1 = arith.constant 0 : i32
    return %c0_i32, %c0_i32_0 : i32, i32
  }
  func.func @transform_4(%arg0: i32) -> (i32, i32) {
    %c0_i32 = arith.constant 0 : i32
    %c0_i32_0 = arith.constant 0 : i32
    %c0_i32_1 = arith.constant 0 : i32
    return %c0_i32, %c0_i32_0 : i32, i32
  }
  func.func @transform_5(%arg0: i32) -> (i32, i32, i32) {
    %c0_i32 = arith.constant 0 : i32
    %c0_i32_0 = arith.constant 0 : i32
    %c0_i32_1 = arith.constant 0 : i32
    %c0_i32_2 = arith.constant 0 : i32
    return %c0_i32, %c0_i32_0, %c0_i32_1 : i32, i32, i32
  }
  func.func @transform_6(%arg0: i32) -> (i32, i32) {
    %c0_i32 = arith.constant 0 : i32
    %c0_i32_0 = arith.constant 0 : i32
    return %arg0, %c0_i32 : i32, i32
  }
}

</mosaic_0001>

<bundles_post_ra>
// kernel: tpu_custom_call.1
= control target key start
LH: loop header
LB: loop body
LE: loop exit
PB: predicated region body
PF: predicated region fallthrough
CT: control target
= control target key end

     0   :  { %11 = vsyncpa [#allocation3], 0  ;;  %s1479_s0 = inlined_call_operand.vmem [shape: f32[16,32], index: 0, kind: input, shape index: {}]   ;;  %s1480_s1 = inlined_call_operand.hbm [shape: f32[16,8,32], index: 1, kind: input, shape index: {}]   ;;  %s1481_s2 = inlined_call_operand.vmem [shape: f32[16,8], index: 2, kind: input, shape index: {}]   ;;  %s1482_s3 = inlined_call_operand.hbm [shape: f32[32,32], index: 3, kind: input, shape index: {}]   ;;  %s1483_s4 = inlined_call_operand.hbm [shape: f32[32,32], index: 4, kind: input, shape index: {}]   ;;  %s1484_s5 = inlined_call_operand.vmem [shape: f32[1,1,32], index: 5, kind: input, shape index: {}]   ;;  %s1485_s6 = inlined_call_operand.hbm [shape: f32[16,32], index: 6, kind: output, shape index: {}]  }
   0x1   :  { %13 = vsyncpa [#allocation3 + $0x1], 0 }
   0x2   :  { %14 = vsyncpa [#allocation6], 0 }
   0x3   :  { %15 = vsyncpa [#allocation4], 0 }
   0x4   :  { %17 = vsyncpa [#allocation4 + $0x1], 0  ;;  %s1250_s21 = smov 0   ;;  %s1252_s22 = smov 0  }
   0x5   :  { %s1254_s23 = smov 0   ;;  %s1256_s24 = smov 0  }
   0x6 LB: > { %s1271_s25 = sadd.s32 4294967295, %s1209_s24   ;;  %s910_s26 = sadd.s32 4294967294, %s1209_s24   ;;  %s1209_s24 = sphi %s1256_s24, %s1499_s24   ;;  %s1205_s23 = sphi %s1254_s23, %s1498_s23   ;;  %s1201_s22 = sphi %s1252_s22, %s1497_s22   ;;  %s1197_s21 = sphi %s1250_s21, %s1496_s21  }
   0x7   : > { %p69_p0 = scmp.ne.s32.totalorder %s1201_s22, %s1197_s21  ;;  %p70_p1 = scmp.eq.s32.totalorder %s1271_s25, 0 }
   0x8   : > { %p182_p2 = scmp.eq.s32.totalorder %s1271_s25, 1  ;;  %p188_p3 = scmp.eq.s32.totalorder %s910_s26, 1 }
   0x9   : > { %p1280_p4 = por %p70_p1, %p69_p0  ;;  %p911_p5 = scmp.ge.s32.totalorder %s1209_s24, 1 }
   0xa   : > { %p1285_p6 = por %p188_p3, %p69_p0  ;;  %p195_p7 = scmp.lt.s32.totalorder %s1209_s24, 3 }
   0xb   : > { %s206_s7 = sshll.u32 %s1482_s3, 4  ;;  %s1211_s9 = smov [#allocation5]   ;;  %s207_s7 = int_to_ptr.hbm [resolvable:$true] %s206_s7 }
   0xc   : > { %p1293_p8 = pnand %p911_p5, %p195_p7  ;;  %s208_s10 = sshll.u32 %s1211_s9, 4  ;;  %s209_s10 = int_to_ptr.vmem [resolvable:$true] %s208_s10 }
   0xd   : > { %s220_s13 = sshll.u32 %s1483_s4, 4  ;;  %s1486_s14 = smov 128   ;;  %s221_s13 = int_to_ptr.hbm [resolvable:$true] %s220_s13 }
   0xe   : > { %p971_p9 = pneg %p1293_p8  ;;  %s1487_s15 = smov 8  }
   0xf   : > { %s1214_s16 = smov [#allocation7]   ;;  %s1312_s18 = sadd.s32 1, %s1209_s24  }
  0x10   : > { %p972_p10 = pnand %p971_p9, %p70_p1  ;;  %s222_s17 = sshll.u32 %s1214_s16, 4  ;;  %s223_s17 = int_to_ptr.vmem [resolvable:$true] %s222_s17 }
  0x11   : > { %s56_s19 = sadd.s32 1, %s1205_s23  ;;  %s53_s20 = ssub.s32 %s1209_s24, %s1312_s18 }
  0x12   : > { %974 = dma.hbm_to_vmem [thread:$0]  (!%p972_p10), %s207_s7, 512, %s209_s10, [#allocation6], %s1486_s14, %s1486_s14, %s1487_s15  }
  0x13   : > { %977 = dma.hbm_to_vmem [thread:$0]  (!%p972_p10), %s221_s13, 512, %s223_s17, [#allocation6], %s1486_s14, %s1486_s14, %s1487_s15  }
  0x14   : > { %p63_p12 = scmp.ne.s32.totalorder %s1205_s23, %s1201_s22  ;;  %p54_p13 = scmp.eq.s32.totalorder %s53_s20, 0 }
  0x15   : > { %p64_p0 = scmp.eq.s32.totalorder %s1209_s24, 0  ;;  %p988_p5 = scmp.lt.s32.totalorder %s1209_s24, 2 }
  0x16   : > { %p1322_p3 = por %p182_p2, %p63_p12  ;;  %s246_s30 = sand.u32 1, %s1205_s23  }
  0x17   : > { %s1328_s29 = scalar_select %p54_p13, %s1205_s23, %s56_s19  }
  0x18   : > { %p65_p7 = por %p64_p0, %p63_p12  ;;  %s915_s7 = sshll.u32 %s246_s30, 6 }
  0x19   : > { %s946_s9 = sshll.u32 %s1209_s24, 6  ;;  %s250_s13 = scalar_lea.vmem [#allocation2], %s915_s7 }
  0x1a   : > { %s255_s12 = scalar_lea.hbm %s1480_s1, %s946_s9  ;;  %s258_s16 = sshll.u32 %s250_s13, 4  ;;  %s259_s16 = int_to_ptr.vmem [resolvable:$true] %s258_s16 }
  0x1b   : > { %s256_s17 = sshll.u32 %s255_s12, 4  ;;  %p1335_p2 = pnand %p988_p5, %p65_p7  ;;  %s257_s17 = int_to_ptr.hbm [resolvable:$true] %s256_s17 }
  0x1c   : > { %s247_s19 = scalar_lea.sflag [#allocation3], %s246_s30  ;;  %s1109_s14 = sshra.s32 %s257_s17, 4  ;;  %s1110_s14 = int_to_ptr.hbm [resolvable:$true] %s1109_s14 }
  0x1d   : > { %s1111_s15 = scalar_lea.hbm %s1110_s14, 64  ;;  %p1113_p10 = pneg %p1335_p2 }
  0x1e   : > { %p1112_p9 = scmp.ne.s32.totalorder %s1110_s14, %s1111_s15  ;;  %s1116_s10 = scalar_lea.hbm %s1480_s1, 128 }
  0x1f   : > { %p1117_p0 = scmp.lt.s32.totalorder %s1110_s14, %s1480_s1  ;;  %p1118_p5 = scmp.lt.s32.totalorder %s1116_s10, %s1111_s15 }
  0x20   : > { %p1114_p12 = pnand %p1113_p10, %p1112_p9 }
  0x21   : > { %p1119_p7 = por %p1118_p5, %p1117_p0 }
  0x22   : > { %p1115_p13 = pneg %p1114_p12 }
  0x24   : > { %p1120_p11 = pnand %p1119_p7, %p1115_p13 }
  0x26   : > { %1123 = shalt.err (!%p1120_p11)
}
  0x27   : > { %s1493_s30 = smov 8   ;;  %s1494_s13 = smov 128  }
  0x28   : > { %981 = dma.hbm_to_vmem [thread:$0]  (!%p1335_p2), %s257_s17, 1024, %s259_s16, %s247_s19, %s1494_s13, %s1494_s13, %s1493_s30  }
  0x29   : > { %277 = sbr.rel (%p1293_p8) target bundleno = 767 (0x2ff), region = 44  ;;  %s1355_s9 = sand.u32 (!%p1293_p8), 1, %s1201_s22  }
  0x2a   : > { %s919_s14 = sshll.u32 (!%p1293_p8), %s1355_s9, 6  ;;  %s280_s15 = scalar_lea.sflag (!%p1293_p8), [#allocation3], %s1355_s9 }
  0x2b   : > { %s1359_s7 = scalar_lea.vmem (!%p1293_p8), [#allocation2], %s919_s14 }
  0x2e   : > { %1184 = dma.done.wait (%p1280_p4), %s280_s15, 1024  }
  0x2f   : > { %1186 = vsyncadd (%p1280_p4), %s280_s15, 4294966272 }
  0x30   : > { %1188 = dma.done.wait (%p70_p1), [#allocation6], 1024  }
  0x31   : > { %1190 = vsyncadd (%p70_p1), [#allocation6], 4294966272  ;;  %p331_p8 = scmp.lt.s32.totalorder %s1271_s25, 1  ;;  %v352_v0 = vld [vmem:[#allocation5 + $0x18] sm:$0xff]  ;;  %v351_v2 = vld [vmem:[#allocation5 + $0x10] sm:$0xff]  ;;  %vm353_vm0 = vcmask 261120  }
  0x32   : > { %v380_v1 = vld [vmem:[#allocation7 + $0x18] sm:$0xff]  ;;  %369 = vmatpush.msra.mxu0 %v352_v0  ;;  %v379_v3 = vld [vmem:[#allocation7 + $0x10] sm:$0xff]  ;;  %v350_v4 = vld [vmem:[#allocation5 + $0x8] sm:$0xff]  ;;  %vm542_vm1 = vcmask 1041409   ;;  %vm544_vm2 = vcmask 1042434   ;;  %vm546_vm3 = vcmask 1043459  }
  0x33   : > { %s1371_s8 = scalar_select %p331_p8, %s1271_s25, 1  ;;  %947 = vmatpush.msra.mxu1 %v380_v1  ;;  %949 = vmatpush.msra.mxu3 %v380_v1  ;;  %v378_v5 = vld [vmem:[#allocation7 + $0x8] sm:$0xff]  ;;  %v349_v6 = vld [vmem:[#allocation5] sm:$0xff]  ;;  %v1381_v10 = vld [vmem:[%s1359_s7 + $0x30] sm:$0xff]  ;;  %vm548_vm4 = vcmask 1044484   ;;  %vm550_vm5 = vcmask 1045509  }
  0x34   : > { %948 = vmatpush.msra.mxu2 %v380_v1  ;;  %370 = vmatpush.msra.mxu0 %v351_v2  ;;  %v377_v7 = vld [vmem:[#allocation7] sm:$0xff]  ;;  %v341_v9 = vld [vmem:[%s1359_s7 + $0x8] sm:$0xff]  ;;  %v342_v13 = vld [vmem:[%s1359_s7 + $0x10] sm:$0xff]  ;;  %vm552_vm6 = vcmask 1046534   ;;  %vm554_vm7 = vcmask 1047559   ;;  %vm558_vm9 = vcmask 64512  }
  0x35   : > { %s923_s16 = sshll.u32 %s1371_s8, 3  ;;  %950 = vmatpush.msra.mxu1 %v379_v3  ;;  %952 = vmatpush.msra.mxu3 %v379_v3  ;;  %v1386_v11 = vld [vmem:[%s1359_s7 + $0x28] sm:$0xff]  ;;  %v340_v12 = vld [vmem:[%s1359_s7] sm:$0xff]  ;;  %v343_v14 = vld [vmem:[%s1359_s7 + $0x18] sm:$0xff]  ;;  %s922_s13 = sshll.u32 %s1355_s9, 3 }
  0x36   : > { %s334_s20 = scalar_lea.vmem %s1479_s0, %s923_s16  ;;  %951 = vmatpush.msra.mxu2 %v379_v3  ;;  %371 = vmatpush.msra.mxu0 %v350_v4  ;;  %v347_v15 = vld [vmem:[%s1359_s7 + $0x38] sm:$0xff]  ;;  %v344_v16 = vld [vmem:[%s1359_s7 + $0x20] sm:$0xff]  ;;  %s339_s30 = scalar_lea.vmem %s1481_s2, %s923_s16 }
  0x37   : > { %953 = vmatpush.msra.mxu1 %v378_v5  ;;  %v348_v8 = vld [vmem:[%s334_s20] sm:$0xff]  ;;  %955 = vmatpush.msra.mxu3 %v378_v5  ;;  %s943_s14 = sshll.u32 %s1271_s25, 3  ;;  %s330_s16 = scalar_lea.vmem [#allocation8], %s922_s13 }
  0x38   : > { %954 = vmatpush.msra.mxu2 %v378_v5  ;;  %372 = vmatpush.msra.mxu0 %v349_v6  ;;  %v1028_v33 = vld [vmem:[%s1484_s5] ss:$0 sm:$0xff]  ;;  %s792_s8 = scalar_lea.hbm %s1485_s6, %s943_s14  ;;  %s794_s27 = sshll.u32 %s330_s16, 4  ;;  %s795_s27 = int_to_ptr.vmem [resolvable:$true] %s794_s27 }
  0x39   : > { %956 = vmatpush.msra.mxu1 %v377_v7  ;;  %925 = vmatmul.msk.f32.vlgmr.msra.gmra.mxu0 %vm353_vm0, %v348_v8  ;;  %s796_s17 = sshll.u32 %s792_s8, 4  ;;  %s782_s25 = scalar_lea.sflag [#allocation4], %s1355_s9  ;;  %s797_s17 = int_to_ptr.hbm [resolvable:$true] %s796_s17 }
  0x3a   : > { %927 = vmatmul.msk.f32.vlgmr.msra.gmra.mxu1 %vm353_vm0, %v341_v9  ;;  %958 = vmatpush.msra.mxu3 %v377_v7  ;;  %s1153_s20 = sshra.s32 %s797_s17, 4  ;;  %s1159_s12 = scalar_lea.hbm %s1485_s6, 16  ;;  %s1154_s20 = int_to_ptr.hbm [resolvable:$true] %s1153_s20 }
  0x3b   : > { %417 = vmatpush.msrb.mxu0 %v380_v1  ;;  %932 = vmatmul.msk.f32.vlgmr.msra.gmra.mxu3 %vm353_vm0, %v1381_v10  ;;  %s1155_s19 = scalar_lea.hbm %s1154_s20, 8  ;;  %p1160_p2 = scmp.lt.s32.totalorder %s1154_s20, %s1485_s6 }
  0x3c   : > { %957 = vmatpush.msra.mxu2 %v377_v7  ;;  %620 = vmatpush.msrb.mxu3 %v341_v9  ;;  %p1156_p1 = scmp.ne.s32.totalorder %s1154_s20, %s1155_s19  ;;  %p1161_p9 = scmp.lt.s32.totalorder %s1159_s12, %s1155_s19 }
  0x3d   : > { %418 = vmatpush.msrb.mxu0 %v379_v3  ;;  %931 = vmatmul.msk.f32.vlgmr.msra.gmra.mxu2 %vm353_vm0, %v1386_v11 }
  0x3e   : > { %598 = vmatpush.msrb.mxu2 %v340_v12  ;;  %664 = vmatpush.msra.mxu3 %v343_v14  ;;  %p1157_p4 = pnand %p1156_p1, %p1322_p3  ;;  %p1162_p10 = por %p1161_p9, %p1160_p2 }
  0x3f   : > { %419 = vmatpush.msrb.mxu0 %v378_v5 }
  0x40   : > { %642 = vmatpush.msra.mxu2 %v342_v13  ;;  %p1158_p11 = pneg %p1157_p4 }
  0x41   : > { %420 = vmatpush.msrb.mxu0 %v377_v7 }
  0x42   : > { %928 = vmatmul.msk.f32.gmra.mxu1 %vm353_vm0, %v342_v13  ;;  %926 = vmatmul.msk.f32.vlgmr.msrb.gmra.mxu0 %vm353_vm0, %v340_v12  ;;  %p1163_p12 = pnand %p1162_p10, %p1158_p11 }
  0x43   : > { %686 = vmatpush.msra.mxu0 %v344_v16  ;;  %933 = vmatmul.msk.f32.gmra.mxu3 %vm353_vm0, %v347_v15 }
  0x45   : > { %752 = vmatpush.msrb.mxu0 %v347_v15 }
  0x4a   : > { %929 = vmatmul.msk.f32.gmra.mxu1 %vm353_vm0, %v343_v14  ;;  %v532_v14 = vlaneseq }
  0x52   : > { %930 = vmatmul.msk.f32.gmra.mxu1 %vm353_vm0, %v344_v16 }
  0xb6   : > { %v374_v17 = vpop.f32.mrf.mxu0 }
  0xb7   : > { %v425_v18 = vpop.f32.mrf.mxu1  ;;  %v447_v19 = vrot.slane %v374_v17, 1  ;;  %v448_v20 = vrot.slane %v374_v17, 2  ;;  %v452_v24 = vrot.slane %v374_v17, 6  ;;  %v454_v25 = vperm.slane %v374_v17, 0 }
  0xb8   : > { %v449_v30 = vrot.slane %v374_v17, 3  ;;  %v453_v34 = vrot.slane %v374_v17, 7  ;;  %v451_v47 = vrot.slane %v374_v17, 5  ;;  %v450_v49 = vrot.slane %v374_v17, 4 }
  0xb9   : > { %v455_v21 = vperm.slane %v447_v19, 0  ;;  %v456_v23 = vperm.slane %v448_v20, 0  ;;  %v460_v31 = vperm.slane %v452_v24, 0  ;;  %v533_v17 = vand.u32 127, %v532_v14 }
  0xba   : > { %v457_v36 = vperm.slane %v449_v30, 0  ;;  %v461_v39 = vperm.slane %v453_v34, 0  ;;  %v459_v53 = vperm.slane %v451_v47, 0  ;;  %v458_v54 = vperm.slane %v450_v49, 0 }
  0xbb   : > { %v471_v22 = vadd.f32 %v455_v21, %v425_v18 }
  0xbd   : > { %1029 = vtanh.f32 %v471_v22 }
  0xbe   : > { %v440_v27 = vpop.f32.mrf.mxu3 }
  0xbf   : > { %v428_v26 = vpop.f32.mrf.mxu1  ;;  %v422_v29 = vpop.f32.mrf.mxu0  ;;  %v476_v37 = vadd.f32 %v460_v31, %v440_v27 }
  0xc0   : > { %v472_v28 = vadd.f32 %v456_v23, %v428_v26  ;;  %v470_v32 = vadd.f32 %v454_v25, %v422_v29  ;;  %v437_v56 = vpop.f32.mrf.mxu2  ;;  %v522_v29 = vld [vmem:[%s339_s30] sm:$0xff] }
  0xc1   : > { %v475_v61 = vadd.f32 %v459_v53, %v437_v56  ;;  %vm523_vm8 = vcmp.gt.f32.partialorder %v522_v29, 0.0 }
  0xc2   : > { %1031 = vtanh.f32 %v472_v28 }
  0xc3   : > { %v1030_v35 = vpop.eup %1029  ;;  %1033 = vtanh.f32 %v470_v32 }
  0xc4   : > { %v491_v38 = vmul.f32 %v1030_v35, %v1028_v33  ;;  %1035 = vtanh.f32 %v476_v37 }
  0xc6   : > { %v443_v41 = vpop.f32.mrf.mxu3  ;;  %v501_v42 = vsel %vm353_vm0, %v491_v38, 0.0 }
  0xc7   : > { %v431_v40 = vpop.f32.mrf.mxu1  ;;  %502 = vadd.xlane.f32.xlu0 %v501_v42  ;;  %v477_v48 = vadd.f32 %v461_v39, %v443_v41 }
  0xc8   : > { %v1032_v43 = vpop.eup %1031  ;;  %v473_v44 = vadd.f32 %v457_v36, %v431_v40 }
  0xc9   : > { %v492_v45 = vmul.f32 %v1032_v43, %v1028_v33  ;;  %v1034_v46 = vpop.eup %1033 }
  0xca   : > { %1037 = vtanh.f32 %v473_v44  ;;  %v490_v51 = vmul.f32 %v1034_v46, %v1028_v33  ;;  %v1036_v55 = vpop.eup %1035 }
  0xcb   : > { %v504_v50 = vsel %vm353_vm0, %v492_v45, 0.0  ;;  %1039 = vtanh.f32 %v477_v48  ;;  %v496_v63 = vmul.f32 %v1036_v55, %v1028_v33 }
  0xcc   : > { %505 = vadd.xlane.f32.xlu1 %v504_v50  ;;  %v498_v52 = vsel %vm353_vm0, %v490_v51, 0.0 }
  0xcd   : > { %v516_v1 = vsel %vm353_vm0, %v496_v63, 0.0 }
  0xcf   : > { %v434_v57 = vpop.f32.mrf.mxu1  ;;  %499 = vadd.xlane.f32.xlu0 %v498_v52 }
  0xd0   : > { %v1038_v58 = vpop.eup %1037  ;;  %v474_v59 = vadd.f32 %v458_v54, %v434_v57 }
  0xd1   : > { %v493_v60 = vmul.f32 %v1038_v58, %v1028_v33  ;;  %v1040_v0 = vpop.eup %1039 }
  0xd2   : > { %1041 = vtanh.f32 %v474_v59  ;;  %v497_v2 = vmul.f32 %v1040_v0, %v1028_v33 }
  0xd3   : > { %v507_v62 = vsel %vm353_vm0, %v493_v60, 0.0  ;;  %1043 = vtanh.f32 %v475_v61 }
  0xd4   : > { %508 = vadd.xlane.f32.xlu1 %v507_v62  ;;  %v519_v5 = vsel %vm353_vm0, %v497_v2, 0.0 }
  0xd7   : > { %517 = vadd.xlane.f32.xlu0 %v516_v1 }
  0xd8   : > { %v1042_v3 = vpop.eup %1041 }
  0xd9   : > { %v494_v4 = vmul.f32 %v1042_v3, %v1028_v33  ;;  %v1044_v7 = vpop.eup %1043 }
  0xda   : > { %v495_v8 = vmul.f32 %v1044_v7, %v1028_v33 }
  0xdb   : > { %v510_v6 = vsel %vm353_vm0, %v494_v4, 0.0 }
  0xdc   : > { %520 = vadd.xlane.f32.xlu1 %v519_v5  ;;  %511 = vadd.xlane.f32.xlu2 %v510_v6  ;;  %v513_v9 = vsel %vm353_vm0, %v495_v8, 0.0 }
  0xe4   : > { %514 = vadd.xlane.f32.xlu2 %v513_v9 }
 0x13a   : > { %v503_v12 = vpop.xlane.xlu0 %502 }
 0x13b   : > { %v535_v20 = vperm.slane %v503_v12, %v533_v17 }
 0x13f   : > { %v506_v13 = vpop.xlane.xlu1 %505 }
 0x140   : > { %v536_v23 = vperm.slane %v506_v13, %v533_v17 }
 0x142   : > { %v500_v15 = vpop.xlane.xlu0 %499 }
 0x143   : > { %v534_v19 = vperm.slane %v500_v15, %v533_v17 }
 0x145   : > { %v543_v21 = vsel %vm542_vm1, %v535_v20, %v534_v19 }
 0x146   : > { %v545_v26 = vsel %vm544_vm2, %v536_v23, %v543_v21 }
 0x147   : > { %v509_v16 = vpop.xlane.xlu1 %508 }
 0x148   : > { %v537_v22 = vperm.slane %v509_v16, %v533_v17 }
 0x14a   : > { %v518_v25 = vpop.xlane.xlu0 %517  ;;  %v547_v30 = vsel %vm546_vm3, %v537_v22, %v545_v26 }
 0x14b   : > { %v540_v32 = vperm.slane %v518_v25, %v533_v17 }
 0x14f   : > { %v512_v18 = vpop.xlane.xlu2 %511  ;;  %v521_v27 = vpop.xlane.xlu1 %520 }
 0x150   : > { %v538_v24 = vperm.slane %v512_v18, %v533_v17  ;;  %v541_v34 = vperm.slane %v521_v27, %v533_v17 }
 0x152   : > { %v549_v33 = vsel %vm548_vm4, %v538_v24, %v547_v30 }
 0x157   : > { %v515_v28 = vpop.xlane.xlu2 %514 }
 0x158   : > { %v539_v31 = vperm.slane %v515_v28, %v533_v17 }
 0x15a   : > { %v551_v35 = vsel %vm550_vm5, %v539_v31, %v549_v33 }
 0x15b   : > { %v553_v36 = vsel %vm552_vm6, %v540_v32, %v551_v35 }
 0x15c   : > { %v555_v37 = vsel %vm554_vm7, %v541_v34, %v553_v36 }
 0x15d   : > { %v557_v38 = vsel %vm523_vm8, %v555_v37, -1e+30 }
 0x15e   : > { %v559_v39 = vsel %vm558_vm9, %v557_v38, -inf }
 0x15f   : > { %560 = vmax.xlane.f32.xlu2 %v559_v39 }
 0x1d2   : > { %v561_v40 = vpop.xlane.xlu2 %560 }
 0x1d3   : > { %v562_v41 = vsub.f32 %v557_v38, %v561_v40 }
 0x1d5   : > { %v563_v42 = vmul.f32 1.442695, %v562_v41 }
 0x1d7   : > { %1045 = vpow2.f32 %v563_v42 }
 0x1dd   : > { %v1046_v43 = vpop.eup %1045 }
 0x1de   : > { %v565_v44 = vsel %vm558_vm9, %v1046_v43, 0.0 }
 0x1df   : > { %566 = vadd.xlane.f32.xlu0 %v565_v44 }
 0x252   : > { %v567_v45 = vpop.xlane.xlu0 %566 }
 0x253   : > { %1047 = vrcp.f32 %v567_v45 }
 0x259   : > { %v1048_v46 = vpop.eup %1047 }
 0x25a   : > { %v569_v47 = vmul.f32 %v1048_v46, %v567_v45 }
 0x25c   : > { %v570_v48 = vsub.f32 2.0, %v569_v47 }
 0x25e   : > { %v571_v49 = vmul.f32 %v1048_v46, %v570_v48 }
 0x260   : > { %v572_v50 = vmul.f32 %v1046_v43, %v571_v49 }
 0x262   : > { %934 = vmatmul.msk.f32.vlgmr.msrb.gmra.mxu2 %vm558_vm9, %v572_v50  ;;  %v574_v51 = vrot.slane %v572_v50, 1  ;;  %v577_v52 = vrot.slane %v572_v50, 4  ;;  %v575_v53 = vrot.slane %v572_v50, 2  ;;  %v576_v54 = vrot.slane %v572_v50, 3 }
 0x263   : > { %708 = vmatpush.msrb.mxu2 %v1386_v11  ;;  %v580_v55 = vrot.slane %v572_v50, 7  ;;  %v578_v56 = vrot.slane %v572_v50, 5  ;;  %v579_v11 = vrot.slane %v572_v50, 6 }
 0x264   : > { %935 = vmatmul.msk.f32.vlgmr.msrb.gmra.mxu3 %vm558_vm9, %v574_v51  ;;  %938 = vmatmul.msk.f32.vlgmr.msra.gmra.mxu0 %vm558_vm9, %v577_v52 }
 0x265   : > { %730 = vmatpush.msrb.mxu3 %v1381_v10 }
 0x26a   : > { %936 = vmatmul.msk.f32.vlgmr.msra.gmra.mxu2 %vm558_vm9, %v575_v53 }
 0x26c   : > { %937 = vmatmul.msk.f32.vlgmr.msra.gmra.mxu3 %vm558_vm9, %v576_v54  ;;  %941 = vmatmul.msk.f32.vlgmr.msrb.gmra.mxu0 %vm558_vm9, %v580_v55 }
 0x272   : > { %939 = vmatmul.msk.f32.vlgmr.msrb.gmra.mxu2 %vm558_vm9, %v578_v56 }
 0x274   : > { %940 = vmatmul.msk.f32.vlgmr.msrb.gmra.mxu3 %vm558_vm9, %v579_v11 }
 0x2e1   : > { %v688_v10 = vpop.f32.mrf.mxu0 }
 0x2e2   : > { %v771_v3 = vrot.slane %v688_v10, 4 }
 0x2e5   : > { %v600_v57 = vpop.f32.mrf.mxu2 }
 0x2e7   : > { %v622_v58 = vpop.f32.mrf.mxu3 }
 0x2e8   : > { %v765_v59 = vrot.slane %v622_v58, 7 }
 0x2e9   : > { %v754_v5 = vpop.f32.mrf.mxu0 }
 0x2ea   : > { %v766_v63 = vsel %vm542_vm1, %v765_v59, %v600_v57  ;;  %v777_v13 = vrot.slane %v754_v5, 1 }
 0x2ed   : > { %v644_v60 = vpop.f32.mrf.mxu2 }
 0x2ee   : > { %v767_v61 = vrot.slane %v644_v60, 6 }
 0x2ef   : > { %v666_v62 = vpop.f32.mrf.mxu3 }
 0x2f0   : > { %v769_v0 = vrot.slane %v666_v62, 5  ;;  %v768_v1 = vsel %vm544_vm2, %v767_v61, %v766_v63 }
 0x2f2   : > { %v770_v2 = vsel %vm546_vm3, %v769_v0, %v768_v1 }
 0x2f3   : > { %v772_v7 = vsel %vm548_vm4, %v771_v3, %v770_v2 }
 0x2f5   : > { %v710_v4 = vpop.f32.mrf.mxu2 }
 0x2f6   : > { %v773_v6 = vrot.slane %v710_v4, 3 }
 0x2f7   : > { %v732_v8 = vpop.f32.mrf.mxu3 }
 0x2f8   : > { %v774_v9 = vsel %vm550_vm5, %v773_v6, %v772_v7  ;;  %v775_v12 = vrot.slane %v732_v8, 2 }
 0x2fa   : > { %v776_v14 = vsel %vm552_vm6, %v775_v12, %v774_v9 }
 0x2fb   : > { %v778_v15 = vsel %vm554_vm7, %v777_v13, %v776_v14 }
 0x2fc   : > { %780 = vst.msk [vmem:[%s330_s16] sm:$0xff] %vm353_vm0, %v778_v15 }
 0x2fd   : > { %1166 = shalt.err (!%p1163_p12)
}
 0x2fe   : > { %969 = dma.vmem_to_hbm [thread:$0]  (%p1322_p3), %s795_s27, 128, %s797_s17, %s782_s25  }
 0x2ff PF: > { %s808_s9 = sand.u32 1, %s1197_s21   ;;  %p1495_p13 = scmp.ge.s32.totalorder %s1209_s24, 2 }
 0x300   : > { %s809_s14 = scalar_lea.sflag [#allocation4], %s808_s9 }
 0x301   : > { %p983_p0 = pnand %p1495_p13, %p1285_p6 }
 0x303   : > { %p984_p5 = pneg %p983_p0 }
 0x305   : > { %1192 = dma.done.wait (%p984_p5), %s809_s14, 128  }
 0x306   : > { %1194 = vsyncadd (%p984_p5), %s809_s14, 4294967168  ;;  %p20_p7 = scmp.ge.s32.totalorder %s1312_s18, 4   ;;  %s1496_s21 = smov %s1201_s22 }
 0x307   : > { %s1497_s22 = smov %s1205_s23  ;;  %s1498_s23 = smov %s1328_s29 }
 0x308   : > { %s1499_s24 = smov %s1312_s18  ;;  %22 = sbr.rel (!%p20_p7) target bundleno = 6 (0x6), region = 103 }
 0x30d   :  { %815 = vsyncpa [#allocation3], 1 }
 0x30e   :  { %817 = vsyncpa [#allocation3 + $0x1], 1 }
 0x30f   :  { %818 = vsyncpa [#allocation6], 1 }
 0x310   :  { %819 = vsyncpa [#allocation4], 1 }
 0x311   :  { %821 = vsyncpa [#allocation4 + $0x1], 1 }

</bundles_post_ra>
